<compile_context>
chip_gen: v6e
topology: v6e:2x2x1
jax: 0.10.0
libtpu: 0.0.40
codegen_flags: <defaults>
</compile_context>

<pallas_src>
import functools

import jax
import jax.numpy as jnp
from jax.experimental import pallas as pl
from jax.experimental.pallas import tpu as pltpu


# -----------------------------------------------------------------------------
# Kernel
# -----------------------------------------------------------------------------
def _decoder_kernel(ref_ref, code_ref, w1f_ref, w1z_ref, b1_ref,
                    w2_ref, b2_ref, out_ref, acc_ref):
    k = pl.program_id(2)

    @pl.when(k == 0)
    def _init():
        # Fuse the final bias into the accumulator init (saves a VPU add later).
        acc_ref[...] = jnp.broadcast_to(b2_ref[...], acc_ref.shape).astype(jnp.float32)

    # first_linear restricted to this H slab, concat fused as split matmul.
    # bf16 x bf16 MXU matmuls with f32 accumulation.
    h = jnp.dot(ref_ref[...].astype(jnp.bfloat16), w1f_ref[...],
                preferred_element_type=jnp.float32)
    h = h + jnp.dot(code_ref[...].astype(jnp.bfloat16), w1z_ref[...],
                    preferred_element_type=jnp.float32)
    h = h + b1_ref[...]                       # broadcast (1, block_h) over batch

    # self.linear is an empty nn.Sequential for decoder_size=[H] -> identity.

    # final_linear partial product for this H slab, accumulated across k.
    acc_ref[...] += jnp.dot(h.astype(jnp.bfloat16), w2_ref[...],
                            preferred_element_type=jnp.float32)

    @pl.when(k == pl.num_programs(2) - 1)
    def _finalize():
        out_ref[...] = acc_ref[...].astype(out_ref.dtype)


# -----------------------------------------------------------------------------
# Parameter preparation (done ONCE, outside the per-call hot path)
# -----------------------------------------------------------------------------
def prepare_decoder_params(w1, b1, w2, b2, feature_dim,
                           weight_dtype=jnp.bfloat16):
    """Convert PyTorch-layout params to kernel layout.

    w1: (H, F+Z) first_linear weight, b1: (H,)
    w2: (F, H)   final_linear weight, b2: (F,)
    Returns (w1f, w1z, b1_2d, w2t, b2_2d) with weights in (in, out) layout,
    cast to `weight_dtype`; biases as (1, dim) f32.
    """
    F = feature_dim
    H = w1.shape[0]
    w1_t = jnp.asarray(w1).T                              # (F+Z, H)
    w1f = w1_t[:F, :].astype(weight_dtype)                # (F, H)
    w1z = w1_t[F:, :].astype(weight_dtype)                # (Z, H)
    w2t = jnp.asarray(w2).T.astype(weight_dtype)          # (H, F)
    b1_2d = jnp.asarray(b1).reshape(1, H).astype(jnp.float32)
    b2_2d = jnp.asarray(b2).reshape(1, F).astype(jnp.float32)
    return w1f, w1z, b1_2d, w2t, b2_2d


def _pick_block(dim, target):
    """Largest multiple of 128 that divides `dim` and is <= target, else dim."""
    t = min(target, dim)
    for cand in range(t - t % 128, 0, -128):
        if dim % cand == 0:
            return cand
    return dim


def _pick_batch_block(B, target=256):
    if B <= target:
        return B
    return target  # multiple of 8; ragged last tile is handled by pl.cdiv


# -----------------------------------------------------------------------------
# Forward wrapper (jitted; contains ONLY the pallas_call)
# -----------------------------------------------------------------------------
@functools.partial(jax.jit, static_argnames=("block_b", "block_f", "block_h"))
def decoder_forward(reference_features, code, w1f, w1z, b1, w2t, b2,
                    *, block_b=None, block_f=None, block_h=None):
    """reference_features: (B, F) f32, code: (B, Z) f32.
    Weights come from `prepare_decoder_params` (bf16, (in, out) layout)."""
    B, F = reference_features.shape
    Z = code.shape[1]
    H = w2t.shape[0]

    if block_b is None:
        block_b = _pick_batch_block(B)
    if block_h is None:
        block_h = _pick_block(H, 512)
    if block_f is None:
        block_f = _pick_block(F, 512)

    grid = (pl.cdiv(B, block_b), F // block_f, H // block_h)

    bytes_weights = ((F + Z) * H + H * F) * 2            # bf16 weights
    bytes_bias = (H + F) * 4
    bytes_acts = B * (F + Z + F) * 4
    cost = pl.CostEstimate(
        flops=2 * B * (F + Z) * H + 2 * B * H * F,
        transcendentals=0,
        bytes_accessed=bytes_weights + bytes_bias + bytes_acts,
    )

    return pl.pallas_call(
        _decoder_kernel,
        out_shape=jax.ShapeDtypeStruct((B, F), reference_features.dtype),
        grid_spec=pltpu.PrefetchScalarGridSpec(
            num_scalar_prefetch=0,
            grid=grid,
            in_specs=[
                pl.BlockSpec((block_b, F), lambda i, j, k: (i, 0)),        # ref feats
                pl.BlockSpec((block_b, Z), lambda i, j, k: (i, 0)),        # code
                pl.BlockSpec((F, block_h), lambda i, j, k: (0, k)),        # W1^T[:F] slab
                pl.BlockSpec((Z, block_h), lambda i, j, k: (0, k)),        # W1^T[F:] slab
                pl.BlockSpec((1, block_h), lambda i, j, k: (0, k)),        # b1 slab
                pl.BlockSpec((block_h, block_f), lambda i, j, k: (k, j)),  # W2^T tile
                pl.BlockSpec((1, block_f), lambda i, j, k: (0, j)),        # b2 tile
            ],
            out_specs=pl.BlockSpec((block_b, block_f), lambda i, j, k: (i, j)),
            scratch_shapes=[pltpu.VMEM((block_b, block_f), jnp.float32)],
        ),
        compiler_params=pltpu.CompilerParams(
            dimension_semantics=("parallel", "parallel", "arbitrary")),
        cost_estimate=cost,
    )(reference_features, code, w1f, w1z, b1, w2t, b2)


# -----------------------------------------------------------------------------
# Pure-JAX reference (PyTorch semantics, f32)
# -----------------------------------------------------------------------------
def _reference_forward(reference_features, code, w1, b1, w2, b2):
    x = jnp.concatenate([reference_features, code], axis=1)
    x = x @ w1.T + b1
    # empty nn.Sequential -> identity
    x = x @ w2.T + b2
    return x


if __name__ == "__main__":
    # Small shapes consistent with the module: feature_dim, z_dim, one hidden layer.
    B = 8            # batch
    F = 128          # feature_dim (stand-in for 256)
    Z = 16           # z_dim
    H = 256          # decoder_size[0] (stand-in for 8192)

    key = jax.random.PRNGKey(0)
    k_ref, k_code, k_w1, k_b1, k_w2, k_b2 = jax.random.split(key, 6)

    reference_features = jax.random.normal(k_ref, (B, F), dtype=jnp.float32)
    code = jax.random.normal(k_code, (B, Z), dtype=jnp.float32)

    # Deterministic parameter init (shapes follow nn.Linear: (out, in) weight).
    w1 = jax.random.normal(k_w1, (H, F + Z), dtype=jnp.float32) * 0.02
    b1 = jax.random.normal(k_b1, (H,), dtype=jnp.float32) * 0.02
    w2 = jax.random.normal(k_w2, (F, H), dtype=jnp.float32) * 0.02
    b2 = jax.random.normal(k_b2, (F,), dtype=jnp.float32) * 0.02

    # One-time parameter prep (transpose/split/bf16 cast) outside the hot path.
    params = prepare_decoder_params(w1, b1, w2, b2, feature_dim=F)
    params = jax.block_until_ready(params)

    out = decoder_forward(reference_features, code, *params)
    out = jax.block_until_ready(out)

    ref = _reference_forward(reference_features, code, w1, b1, w2, b2)
    assert out.shape == (B, F), out.shape
    rel_err = jnp.linalg.norm(out - ref) / (jnp.linalg.norm(ref) + 1e-8)
    assert rel_err < 2e-2, f"mismatch vs. reference, rel_err={rel_err}"

    print("KERNEL_OK")
</pallas_src>

<mosaic_0001>
module attributes {stable_mosaic.version = 11 : i64} {
  func.func @_decoder_kernel(%arg0: i32, %arg1: i32, %arg2: i32, %arg3: memref<8x128xf32, #tpu.memory_space<vmem>>, %arg4: memref<8x16xf32, #tpu.memory_space<vmem>>, %arg5: memref<128x256xbf16, #tpu.memory_space<vmem>>, %arg6: memref<16x256xbf16, #tpu.memory_space<vmem>>, %arg7: memref<1x256xf32, #tpu.memory_space<vmem>>, %arg8: memref<256x128xbf16, #tpu.memory_space<vmem>>, %arg9: memref<1x128xf32, #tpu.memory_space<vmem>>, %arg10: memref<8x128xf32, #tpu.memory_space<vmem>>, %arg11: memref<8x128xf32, #tpu.memory_space<vmem>>) attributes {dimension_semantics = [#tpu.dimension_semantics<parallel>, #tpu.dimension_semantics<parallel>, #tpu.dimension_semantics<arbitrary>], iteration_bounds = array<i64: 1, 1, 1>, scalar_prefetch = 0 : i64, scratch_operands = 1 : i64, tpu.core_type = #tpu.core_type<tc>, window_params = [{transform_indices = @transform_0, window_bounds = array<i64: 8, 128>}, {transform_indices = @transform_1, window_bounds = array<i64: 8, 16>}, {transform_indices = @transform_2, window_bounds = array<i64: 128, 256>}, {transform_indices = @transform_3, window_bounds = array<i64: 16, 256>}, {transform_indices = @transform_4, window_bounds = array<i64: 1, 256>}, {transform_indices = @transform_5, window_bounds = array<i64: 256, 128>}, {transform_indices = @transform_6, window_bounds = array<i64: 1, 128>}, {transform_indices = @transform_7, window_bounds = array<i64: 8, 128>}]} {
    %c0_i32 = arith.constant 0 : i32
    %0 = arith.cmpi eq, %arg2, %c0_i32 : i32
    %1 = arith.extui %0 : i1 to i32
    %c0_i32_0 = arith.constant 0 : i32
    %2 = arith.cmpi ne, %1, %c0_i32_0 : i32
    scf.if %2 {
      %c0_20 = arith.constant 0 : index
      %c0_21 = arith.constant 0 : index
      %24 = vector.load %arg9[%c0_20, %c0_21] : memref<1x128xf32, #tpu.memory_space<vmem>>, vector<1x128xf32>
      %25 = vector.shape_cast %24 : vector<1x128xf32> to vector<1x128xf32>
      %26 = vector.broadcast %25 : vector<1x128xf32> to vector<8x128xf32>
      %c0_22 = arith.constant 0 : index
      %c0_23 = arith.constant 0 : index
      %27 = vector.load %arg11[%c0_22, %c0_23] : memref<8x128xf32, #tpu.memory_space<vmem>>, vector<8x128xf32>
      tpu.vector_store %arg11[%c0_22, %c0_23], %26 {strides = array<i32>} : memref<8x128xf32, #tpu.memory_space<vmem>>, vector<8x128xf32>,
    } else {
    }
    %c0 = arith.constant 0 : index
    %c0_1 = arith.constant 0 : index
    %3 = vector.load %arg3[%c0, %c0_1] : memref<8x128xf32, #tpu.memory_space<vmem>>, vector<8x128xf32>
    %4 = arith.truncf %3 : vector<8x128xf32> to vector<8x128xbf16>
    %c0_2 = arith.constant 0 : index
    %c0_3 = arith.constant 0 : index
    %5 = vector.load %arg5[%c0_2, %c0_3] : memref<128x256xbf16, #tpu.memory_space<vmem>>, vector<128x256xbf16>
    %cst = arith.constant dense<0.000000e+00> : vector<8x256xf32>
    %6 = tpu.matmul %4, %5, %cst {dimension_numbers = #tpu.dot_dimension_numbers<[1], [0], [0], [1], [0, 0, 1, 1], [], []>} : vector<8x128xbf16>, vector<128x256xbf16>, vector<8x256xf32> -> vector<8x256xf32>
    %c0_4 = arith.constant 0 : index
    %c0_5 = arith.constant 0 : index
    %7 = vector.load %arg4[%c0_4, %c0_5] : memref<8x16xf32, #tpu.memory_space<vmem>>, vector<8x16xf32>
    %8 = arith.truncf %7 : vector<8x16xf32> to vector<8x16xbf16>
    %c0_6 = arith.constant 0 : index
    %c0_7 = arith.constant 0 : index
    %9 = vector.load %arg6[%c0_6, %c0_7] : memref<16x256xbf16, #tpu.memory_space<vmem>>, vector<16x256xbf16>
    %cst_8 = arith.constant dense<0.000000e+00> : vector<8x256xf32>
    %10 = tpu.matmul %8, %9, %cst_8 {dimension_numbers = #tpu.dot_dimension_numbers<[1], [0], [0], [1], [0, 0, 1, 1], [], []>} : vector<8x16xbf16>, vector<16x256xbf16>, vector<8x256xf32> -> vector<8x256xf32>
    %11 = arith.addf %6, %10 : vector<8x256xf32>
    %c0_9 = arith.constant 0 : index
    %c0_10 = arith.constant 0 : index
    %12 = vector.load %arg7[%c0_9, %c0_10] : memref<1x256xf32, #tpu.memory_space<vmem>>, vector<1x256xf32>
    %13 = vector.broadcast %12 : vector<1x256xf32> to vector<8x256xf32>
    %14 = arith.addf %11, %13 : vector<8x256xf32>
    %c0_11 = arith.constant 0 : index
    %c0_12 = arith.constant 0 : index
    %15 = vector.load %arg11[%c0_11, %c0_12] : memref<8x128xf32, #tpu.memory_space<vmem>>, vector<8x128xf32>
    %16 = arith.truncf %14 : vector<8x256xf32> to vector<8x256xbf16>
    %c0_13 = arith.constant 0 : index
    %c0_14 = arith.constant 0 : index
    %17 = vector.load %arg8[%c0_13, %c0_14] : memref<256x128xbf16, #tpu.memory_space<vmem>>, vector<256x128xbf16>
    %cst_15 = arith.constant dense<0.000000e+00> : vector<8x128xf32>
    %18 = tpu.matmul %16, %17, %cst_15 {dimension_numbers = #tpu.dot_dimension_numbers<[1], [0], [0], [1], [0, 0, 1, 1], [], []>} : vector<8x256xbf16>, vector<256x128xbf16>, vector<8x128xf32> -> vector<8x128xf32>
    %19 = arith.addf %15, %18 : vector<8x128xf32>
    %c0_16 = arith.constant 0 : index
    %c0_17 = arith.constant 0 : index
    %20 = vector.load %arg11[%c0_16, %c0_17] : memref<8x128xf32, #tpu.memory_space<vmem>>, vector<8x128xf32>
    tpu.vector_store %arg11[%c0_16, %c0_17], %19 {strides = array<i32>} : memref<8x128xf32, #tpu.memory_space<vmem>>, vector<8x128xf32>,
    %c0_i32_18 = arith.constant 0 : i32
    %21 = arith.cmpi eq, %arg2, %c0_i32_18 : i32
    %22 = arith.extui %21 : i1 to i32
    %c0_i32_19 = arith.constant 0 : i32
    %23 = arith.cmpi ne, %22, %c0_i32_19 : i32
    scf.if %23 {
      %c0_20 = arith.constant 0 : index
      %c0_21 = arith.constant 0 : index
      %24 = vector.load %arg11[%c0_20, %c0_21] : memref<8x128xf32, #tpu.memory_space<vmem>>, vector<8x128xf32>
      %c0_22 = arith.constant 0 : index
      %c0_23 = arith.constant 0 : index
      %25 = vector.load %arg10[%c0_22, %c0_23] : memref<8x128xf32, #tpu.memory_space<vmem>>, vector<8x128xf32>
      tpu.vector_store %arg10[%c0_22, %c0_23], %24 {strides = array<i32>} : memref<8x128xf32, #tpu.memory_space<vmem>>, vector<8x128xf32>,
    } else {
    }
    return
  }
  func.func @transform_0(%arg0: i32, %arg1: i32, %arg2: i32) -> (i32, i32) {
    %c0_i32 = arith.constant 0 : i32
    %c0_i32_0 = arith.constant 0 : i32
    return %arg0, %c0_i32 : i32, i32
  }
  func.func @transform_1(%arg0: i32, %arg1: i32, %arg2: i32) -> (i32, i32) {
    %c0_i32 = arith.constant 0 : i32
    %c0_i32_0 = arith.constant 0 : i32
    return %arg0, %c0_i32 : i32, i32
  }
  func.func @transform_2(%arg0: i32, %arg1: i32, %arg2: i32) -> (i32, i32) {
    %c0_i32 = arith.constant 0 : i32
    %c0_i32_0 = arith.constant 0 : i32
    return %c0_i32, %arg2 : i32, i32
  }
  func.func @transform_3(%arg0: i32, %arg1: i32, %arg2: i32) -> (i32, i32) {
    %c0_i32 = arith.constant 0 : i32
    %c0_i32_0 = arith.constant 0 : i32
    return %c0_i32, %arg2 : i32, i32
  }
  func.func @transform_4(%arg0: i32, %arg1: i32, %arg2: i32) -> (i32, i32) {
    %c0_i32 = arith.constant 0 : i32
    %c0_i32_0 = arith.constant 0 : i32
    return %c0_i32, %arg2 : i32, i32
  }
  func.func @transform_5(%arg0: i32, %arg1: i32, %arg2: i32) -> (i32, i32) {
    %c0_i32 = arith.constant 0 : i32
    return %arg2, %arg1 : i32, i32
  }
  func.func @transform_6(%arg0: i32, %arg1: i32, %arg2: i32) -> (i32, i32) {
    %c0_i32 = arith.constant 0 : i32
    %c0_i32_0 = arith.constant 0 : i32
    return %c0_i32, %arg1 : i32, i32
  }
  func.func @transform_7(%arg0: i32, %arg1: i32, %arg2: i32) -> (i32, i32) {
    %c0_i32 = arith.constant 0 : i32
    return %arg0, %arg1 : i32, i32
  }
}

</mosaic_0001>

<bundles_post_ra>
// kernel: decoder_forward.1
= control target key start
LH: loop header
LB: loop body
LE: loop exit
PB: predicated region body
PF: predicated region fallthrough
CT: control target
= control target key end

     0   :  { %12 = vsyncpa [#allocation4], 0  ;;  %s826_s0 = inlined_call_operand.hbm [shape: f32[8,128], index: 0, kind: input, shape index: {}]   ;;  %s827_s1 = inlined_call_operand.hbm [shape: f32[8,16], index: 1, kind: input, shape index: {}]   ;;  %s828_s2 = inlined_call_operand.hbm [shape: bf16[128,256], index: 2, kind: input, shape index: {}]   ;;  %s829_s3 = inlined_call_operand.hbm [shape: bf16[16,256], index: 3, kind: input, shape index: {}]   ;;  %s830_s4 = inlined_call_operand.vmem [shape: f32[1,256], index: 4, kind: input, shape index: {}]   ;;  %s831_s5 = inlined_call_operand.hbm [shape: bf16[256,128], index: 5, kind: input, shape index: {}]   ;;  %s832_s6 = inlined_call_operand.vmem [shape: f32[1,128], index: 6, kind: input, shape index: {}]   ;;  %s833_s7 = inlined_call_operand.hbm [shape: f32[8,128], index: 7, kind: output, shape index: {}]  }
   0x1   :  { %13 = vsyncpa [#allocation7], 0 }
   0x2   :  { %14 = vsyncpa [#allocation10], 0 }
   0x3   :  { %15 = vsyncpa [#allocation5], 0  ;;  %s751_s24 = smov [#allocation6]  }
   0x4   :  { %s32_s25 = sshll.u32 %s751_s24, 4  ;;  %s33_s25 = int_to_ptr.vmem [resolvable:$true] %s32_s25 }
   0x5   :  { %s631_s26 = scalar_lea.vmem %s33_s25, 128  ;;  %p636_p1 = scmp.lt.s32.totalorder %s33_s25, %s33_s25 }
   0x6   :  { %p632_p0 = scmp.ne.s32.totalorder %s33_s25, %s631_s26  ;;  %p637_p2 = scmp.lt.s32.totalorder %s631_s26, %s631_s26 }
   0x8   :  { %p638_p3 = por %p637_p2, %p636_p1 }
   0xa   :  { %p639_p4 = pnand %p638_p3, %p632_p0 }
   0xc   :  { %642 = shalt.err (!%p639_p4)
}
   0xd   :  { %35 = dma.hbm_to_vmem [thread:$0]  %s827_s1, 128, %s33_s25, [#allocation7]  }
   0xe   :  { %s752_s29 = smov [#allocation9]   ;;  %s753_s8 = smov [#allocation3]  }
   0xf   :  { %s53_s30 = sshll.u32 %s752_s29, 4  ;;  %s22_s9 = sshll.u32 %s753_s8, 4  ;;  %s54_s30 = int_to_ptr.vmem [resolvable:$true] %s53_s30  ;;  %s23_s9 = int_to_ptr.vmem [resolvable:$true] %s22_s9 }
  0x10   :  { %s651_s10 = scalar_lea.vmem %s54_s30, 256  ;;  %p656_p6 = scmp.lt.s32.totalorder %s54_s30, %s54_s30 }
  0x11   :  { %p652_p5 = scmp.ne.s32.totalorder %s54_s30, %s651_s10  ;;  %p657_p7 = scmp.lt.s32.totalorder %s651_s10, %s651_s10 }
  0x13   :  { %p658_p8 = por %p657_p7, %p656_p6 }
  0x15   :  { %p659_p9 = pnand %p658_p8, %p652_p5 }
  0x17   :  { %662 = shalt.err (!%p659_p9)
}
  0x18   :  { %s754_s11 = smov 128   ;;  %s755_s12 = smov 8  }
  0x19   :  { %59 = dma.hbm_to_vmem [thread:$0]  %s829_s3, 256, %s54_s30, [#allocation10], %s754_s11, %s754_s11, %s755_s12  }
  0x1a   :  { %s671_s1 = scalar_lea.vmem %s23_s9, 128  ;;  %p676_p11 = scmp.lt.s32.totalorder %s23_s9, %s23_s9 }
  0x1b   :  { %p672_p10 = scmp.ne.s32.totalorder %s23_s9, %s671_s1  ;;  %p677_p12 = scmp.lt.s32.totalorder %s671_s1, %s671_s1 }
  0x1d   :  { %p678_p13 = por %p677_p12, %p676_p11 }
  0x1f   :  { %p679_p0 = pnand %p678_p13, %p672_p10 }
  0x21   :  { %682 = shalt.err (!%p679_p0)
}
  0x22   :  { %25 = dma.hbm_to_vmem [thread:$0]  %s826_s0, 128, %s23_s9, [#allocation4]  }
  0x23   :  { %s756_s17 = smov [#allocation8]   ;;  %s757_s19 = smov [#allocation11]  }
  0x24   :  { %s41_s18 = sshll.u32 %s756_s17, 4  ;;  %s67_s20 = sshll.u32 %s757_s19, 4  ;;  %s42_s18 = int_to_ptr.vmem [resolvable:$true] %s41_s18  ;;  %s68_s20 = int_to_ptr.vmem [resolvable:$true] %s67_s20 }
  0x25   :  { %s691_s21 = scalar_lea.vmem %s42_s18, 2048  ;;  %p696_p2 = scmp.lt.s32.totalorder %s42_s18, %s42_s18 }
  0x26   :  { %p692_p1 = scmp.ne.s32.totalorder %s42_s18, %s691_s21  ;;  %p697_p3 = scmp.lt.s32.totalorder %s691_s21, %s691_s21 }
  0x28   :  { %p698_p4 = por %p697_p3, %p696_p2 }
  0x2a   :  { %p699_p5 = pnand %p698_p4, %p692_p1 }
  0x2c   :  { %702 = shalt.err (!%p699_p5)
}
  0x2d   :  { %47 = dma.hbm_to_vmem [thread:$0]  %s828_s2, 2048, %s42_s18, [#allocation7], %s754_s11, %s754_s11, %s755_s12  }
  0x2e   :  { %s711_s23 = scalar_lea.vmem %s68_s20, 2048  ;;  %p716_p7 = scmp.lt.s32.totalorder %s68_s20, %s68_s20 }
  0x2f   :  { %p712_p6 = scmp.ne.s32.totalorder %s68_s20, %s711_s23  ;;  %p717_p8 = scmp.lt.s32.totalorder %s711_s23, %s711_s23 }
  0x31   :  { %p718_p9 = por %p717_p8, %p716_p7 }
  0x33   :  { %p719_p10 = pnand %p718_p9, %p712_p6 }
  0x35   :  { %722 = shalt.err (!%p719_p10)
}
  0x36   :  { %s758_s0 = smov 64   ;;  %s759_s24 = smov 4  }
  0x37   :  { %73 = dma.hbm_to_vmem [thread:$0]  %s831_s5, 2048, %s68_s20, [#allocation10], %s758_s0, %s758_s0, %s759_s24  }
  0x38   :  { %743 = dma.done.wait [#allocation4], 128  }
  0x39   :  { %744 = vsyncadd [#allocation4], 4294967168 }
  0x3a   :  { %745 = dma.done.wait [#allocation7], 2176  }
  0x3b   :  { %746 = vsyncadd [#allocation7], 4294965120 }
  0x3c   :  { %747 = dma.done.wait [#allocation10], 2304  }
  0x3d   :  { %748 = vsyncadd [#allocation10], 4294964992  ;;  %v760_v0 = vmov 0   ;;  %v580_v1 = vld [vmem:[#allocation8 + $0x74] ss:$8 sps:$4 sm:$0xff]   ;;  %vm136_vm0 = vcmask 130048   ;;  %v304_v43 = vlaneseq }
  0x3e   :  { %172 = vmatprep.mubr.bf16.mxu0 %v760_v0  ;;  %293 = vmatprep.mubr.bf16.mxu1 %v760_v0  ;;  %v582_v2 = vld [vmem:[#allocation8 + $0x70] ss:$8 sps:$4 sm:$0xff]   ;;  %v583_v3 = vld [vmem:[#allocation8 + $0x64] ss:$8 sps:$4 sm:$0xff]   ;;  %v585_v4 = vld [vmem:[#allocation8 + $0x60] ss:$8 sps:$4 sm:$0xff]  }
  0x3f   :  { %261 = vmatprep.subr.bf16.mxu1 %v580_v1  ;;  %v586_v5 = vld [vmem:[#allocation8 + $0x54] ss:$8 sps:$4 sm:$0xff]   ;;  %v588_v6 = vld [vmem:[#allocation8 + $0x50] ss:$8 sps:$4 sm:$0xff]   ;;  %v589_v7 = vld [vmem:[#allocation8 + $0x44] ss:$8 sps:$4 sm:$0xff]  }
  0x40   :  { %262 = vmatpush1.bf16.msra.mxu1 %v582_v2  ;;  %v598_v8 = vld [vmem:[#allocation9 + $0x4] ss:$8 sps:$4 sm:$0xff]   ;;  %v600_v9 = vld [vmem:[#allocation9] ss:$8 sps:$4 sm:$0xff]   ;;  %v122_v10 = vld [vmem:[#allocation6] sm:$0xff]  ;;  %v305_v44 = vshrl.u32 %v304_v43, 7 }
  0x41   :  { %263 = vmatprep.subr.bf16.mxu1 %v583_v3  ;;  %154 = vmatprep.subr.bf16.mxu0 %v598_v8  ;;  %v591_v11 = vld [vmem:[#allocation8 + $0x40] ss:$8 sps:$4 sm:$0xff]   ;;  %v123_v12 = vpack.c.bf16 %v122_v10, %v122_v10  ;;  %v592_v13 = vld [vmem:[#allocation8 + $0x34] ss:$8 sps:$4 sm:$0xff]   ;;  %v594_v14 = vld [vmem:[#allocation8 + $0x30] ss:$8 sps:$4 sm:$0xff]  }
  0x42   :  { %155 = vmatpush1.bf16.msra.mxu0 %v600_v9  ;;  %v607_v15 = vld [vmem:[#allocation11 + $0x78] sm:$0xff]   ;;  %v609_v18 = vld [vmem:[#allocation11 + $0x70] sm:$0xff]   ;;  %v611_v21 = vld [vmem:[#allocation11 + $0x68] sm:$0xff]   ;;  %v306_v45 = vsub.s32 0, %v305_v44  ;;  %v310_v47 = vsub.s32 1, %v305_v44 }
  0x43   :  { %v595_v16 = vld [vmem:[#allocation8 + $0x24] ss:$8 sps:$4 sm:$0xff]   ;;  %547 = vmatprep.subr.bf16.mxu0 %v607_v15  ;;  %v597_v20 = vld [vmem:[#allocation8 + $0x20] ss:$8 sps:$4 sm:$0xff]   ;;  %v601_v22 = vld [vmem:[#allocation8 + $0x14] ss:$8 sps:$4 sm:$0xff]  }
  0x44   :  { %264 = vmatpush1.bf16.msra.mxu1 %v585_v4  ;;  %v608_v17 = vld [vmem:[#allocation11 + $0x38] sm:$0xff]   ;;  %v610_v19 = vld [vmem:[#allocation11 + $0x30] sm:$0xff]   ;;  %v612_v23 = vld [vmem:[#allocation11 + $0x28] sm:$0xff]  }
  0x45   :  { %265 = vmatprep.subr.bf16.mxu1 %v586_v5  ;;  %514 = vmatmul.mubr.msk.bf16.vlgmr.msra.gmra.mxu0 %vm136_vm0, %v123_v12  ;;  %v613_v24 = vld [vmem:[#allocation11 + $0x60] sm:$0xff]   ;;  %v604_v26 = vld [vmem:[#allocation8 + $0x4] ss:$8 sps:$4 sm:$0xff]   ;;  %v606_v28 = vld [vmem:[#allocation8] ss:$8 sps:$4 sm:$0xff]  }
  0x46   :  { %548 = vmatpush3.bf16.msra.mxu0 %v608_v17  ;;  %v603_v25 = vld [vmem:[#allocation8 + $0x10] ss:$8 sps:$4 sm:$0xff]   ;;  %v615_v31 = vld [vmem:[#allocation11 + $0x58] sm:$0xff]   ;;  %v617_v33 = vld [vmem:[#allocation11 + $0x50] sm:$0xff]  }
  0x47   :  { %549 = vmatprep.subr.bf16.mxu0 %v609_v18  ;;  %v614_v27 = vld [vmem:[#allocation11 + $0x20] sm:$0xff]   ;;  %v616_v32 = vld [vmem:[#allocation11 + $0x18] sm:$0xff]   ;;  %v618_v34 = vld [vmem:[#allocation11 + $0x10] sm:$0xff]  }
  0x48   :  { %266 = vmatpush1.bf16.msra.mxu1 %v588_v6  ;;  %v104_v29 = vld [vmem:[#allocation3] sm:$0xff]  ;;  %v619_v35 = vld [vmem:[#allocation11 + $0x48] sm:$0xff]  }
  0x49   :  { %267 = vmatprep.subr.bf16.mxu1 %v589_v7  ;;  %v105_v30 = vpack.c.bf16 %v104_v29, %v104_v29  ;;  %v620_v36 = vld [vmem:[#allocation11 + $0x8] sm:$0xff]   ;;  %v621_v37 = vld [vmem:[#allocation11 + $0x40] sm:$0xff]  }
  0x4a   :  { %550 = vmatpush3.bf16.msra.mxu0 %v610_v19  ;;  %v622_v38 = vld [vmem:[#allocation11] sm:$0xff]  }
  0x4b   :  { %551 = vmatprep.subr.bf16.mxu0 %v611_v21  ;;  %v302_v46 = vld [vmem:[%s830_s4] sm:$0x3]  ;;  %s761_s4 = smov [#allocation12]  }
  0x4c   :  { %268 = vmatpush1.bf16.msra.mxu1 %v591_v11  ;;  %v307_v49 = vrot.slane %v302_v46, %v306_v45  ;;  %v311_v51 = vrot.slane %v302_v46, %v310_v47  ;;  %v511_v61 = vld [vmem:[%s832_s6] ss:$0 sm:$0xff]  ;;  %s500_s29 = sshll.u32 %s761_s4, 4  ;;  %s501_s29 = int_to_ptr.vmem [resolvable:$true] %s500_s29 }
  0x4d   :  { %269 = vmatprep.subr.bf16.mxu1 %v592_v13  ;;  %s723_s30 = scalar_lea.vmem %s501_s29, 128  ;;  %p728_p12 = scmp.lt.s32.totalorder %s501_s29, %s501_s29 }
  0x4e   :  { %552 = vmatpush3.bf16.msra.mxu0 %v612_v23  ;;  %p724_p11 = scmp.ne.s32.totalorder %s501_s29, %s723_s30  ;;  %p729_p13 = scmp.lt.s32.totalorder %s723_s30, %s723_s30 }
  0x4f   :  { %553 = vmatprep.subr.bf16.mxu0 %v613_v24 }
  0x50   :  { %270 = vmatpush1.bf16.msra.mxu1 %v594_v14  ;;  %p730_p0 = por %p729_p13, %p728_p12 }
  0x51   :  { %271 = vmatprep.subr.bf16.mxu1 %v595_v16 }
  0x52   :  { %554 = vmatpush3.bf16.msra.mxu0 %v614_v27  ;;  %p731_p1 = pnand %p730_p0, %p724_p11 }
  0x53   :  { %555 = vmatprep.subr.bf16.mxu0 %v615_v31 }
  0x54   :  { %272 = vmatpush1.bf16.msra.mxu1 %v597_v20 }
  0x55   :  { %273 = vmatprep.subr.bf16.mxu1 %v601_v22 }
  0x56   :  { %556 = vmatpush3.bf16.msra.mxu0 %v616_v32 }
  0x57   :  { %557 = vmatprep.subr.bf16.mxu0 %v617_v33 }
  0x58   :  { %274 = vmatpush1.bf16.msra.mxu1 %v603_v25 }
  0x59   :  { %275 = vmatprep.subr.bf16.mxu1 %v604_v26 }
  0x5a   :  { %558 = vmatpush3.bf16.msra.mxu0 %v618_v34 }
  0x5b   :  { %559 = vmatprep.subr.bf16.mxu0 %v619_v35 }
  0x5c   :  { %276 = vmatpush1.bf16.msra.mxu1 %v606_v28 }
  0x5e   :  { %560 = vmatpush3.bf16.msra.mxu0 %v620_v36 }
  0x5f   :  { %294 = vmatmul.mubr.bf16.vlgmr.msra.gmra.mxu1 %v105_v30  ;;  %561 = vmatprep.subr.bf16.mxu0 %v621_v37 }
  0x62   :  { %562 = vmatpush3.bf16.msra.mxu0 %v622_v38 }
 0x105   :  { %v174_v39 = vpop.f32.mrf.mxu0 }
 0x107   :  { %v176_v40 = vpop.f32.mrf.mxu0 }
 0x109   :  { %v178_v41 = vpop.f32.mrf.mxu0 }
 0x10b   :  { %v179_v42 = vpop.f32.mrf.mxu0 }
 0x11f   :  { %v295_v48 = vpop.f32.mrf.mxu1 }
 0x120   :  { %v296_v50 = vadd.f32 %v295_v48, %v174_v39 }
 0x121   :  { %v297_v52 = vpop.f32.mrf.mxu1 }
 0x122   :  { %v298_v53 = vadd.f32 %v297_v52, %v176_v40  ;;  %v314_v54 = vadd.f32 %v307_v49, %v296_v50 }
 0x123   :  { %v299_v55 = vpop.f32.mrf.mxu1 }
 0x124   :  { %v315_v56 = vadd.f32 %v311_v51, %v298_v53  ;;  %v317_v59 = vpack.c.bf16 %v314_v54, %v314_v54 }
 0x125   :  { %v300_v57 = vpop.f32.mrf.mxu1 }
 0x126   :  { %v318_v58 = vpack.c.bf16 %v315_v56, %v315_v56 }
 0x128   :  { %479 = vmatprep.mubr.bf16.mxu0 %v318_v58 }
 0x129   :  { %480 = vmatmul.mubr.bf16.vlgmr.msra.gmra.mxu0 %v317_v59 }
 0x1e9   :  { %v563_v60 = vpop.f32.mrf.mxu0 }
 0x1eb   :  { %v564_v62 = vpop.f32.mrf.mxu0 }
 0x1ec   :  { %v565_v63 = vadd.f32 %v564_v62, %v563_v60 }
 0x1ed   :  { %v566_v0 = vpop.f32.mrf.mxu0 }
 0x1ee   :  { %v487_v1 = vadd.f32 %v565_v63, %v511_v61 }
 0x1ef   :  { %v567_v2 = vpop.f32.mrf.mxu0 }
 0x1f0   :  { %493 = vst [vmem:[#allocation12] sm:$0xff] %v487_v1 }
 0x1f1   :  { %734 = shalt.err (!%p731_p1)
}
 0x1f2   :  { %503 = dma.vmem_to_hbm [thread:$0]  %s501_s29, 128, %s833_s7, [#allocation5]  }
 0x1f3   :  { %749 = dma.done.wait [#allocation5], 128  }
 0x1f4   :  { %750 = vsyncadd [#allocation5], 4294967168 }
 0x1f5   :  { %507 = vsyncpa [#allocation4], 1 }
 0x1f6   :  { %508 = vsyncpa [#allocation7], 1 }
 0x1f7   :  { %509 = vsyncpa [#allocation10], 1 }
 0x1f8   :  { %510 = vsyncpa [#allocation5], 1 }

</bundles_post_ra>
